<compile_context>
chip_gen: v6e
topology: v6e:2x2x1
jax: 0.10.0
libtpu: 0.0.40
codegen_flags: <defaults>
</compile_context>

<pallas_src>
import functools
import math

import jax
import jax.numpy as jnp
from jax.experimental import pallas as pl
from jax.experimental.pallas import tpu as pltpu

_LN_EPS = 1e-5  # nn.LayerNorm default


def _gelu_tanh(x):
    # TODO(synk): PyTorch nn.GELU() defaults to the exact erf formulation; the tanh
    # approximation (max abs deviation ~5e-4) is used since tanh has a guaranteed
    # EUP lowering inside Mosaic.
    c = math.sqrt(2.0 / math.pi)
    return 0.5 * x * (1.0 + jnp.tanh(c * (x + 0.044715 * (x * x * x))))


def _layernorm(x, gamma, beta, eps):
    mu = jnp.mean(x, axis=-1, keepdims=True)
    xc = x - mu
    var = jnp.mean(xc * xc, axis=-1, keepdims=True)
    return xc * jax.lax.rsqrt(var + eps) * gamma + beta


# ---------------------------------------------------------------------------
# Fused per-layer kernel:
#   x <- x + Attention(LN1(x));  x <- x + FFN(LN2(x))
# ---------------------------------------------------------------------------
def _layer_kernel(x_ref, ln1g_ref, ln1b_ref, wqkv_ref, wo_ref, bo_ref,
                  ln2g_ref, ln2b_ref, w1_ref, b1_ref, w2_ref, b2_ref, o_ref,
                  *, heads, head_dim, compute_dtype, approx_recip):
    BT, N, C = x_ref.shape
    R = BT * N
    inner = heads * head_dim

    x = x_ref[...].reshape(R, C)                       # residual stream, f32

    # ------------------- PreNorm + Attention -------------------
    xn = _layernorm(x, ln1g_ref[...], ln1b_ref[...], _LN_EPS).astype(compute_dtype)
    # Single fused QKV projection (softmax scale is pre-folded into the Q
    # columns by prepare_params): one weight DMA / MXU push sequence.
    qkv = jnp.dot(xn, wqkv_ref[...],
                  preferred_element_type=jnp.float32)  # (R, 3*inner), f32

    # Per-head scaled-dot-product attention.  The Python loop over heads is
    # layout-only (static value lane-slices, no VMEM scratch, no masked
    # stores); each einsum is batched over BT and Mosaic unrolls head batches
    # into per-head MXU passes anyway.
    ctx_heads = []
    for h in range(heads):
        q_h = qkv[:, h * head_dim:(h + 1) * head_dim].reshape(BT, N, head_dim)
        k_h = qkv[:, inner + h * head_dim: inner + (h + 1) * head_dim].reshape(BT, N, head_dim)
        v_h = qkv[:, 2 * inner + h * head_dim: 2 * inner + (h + 1) * head_dim].reshape(BT, N, head_dim)

        dots = jnp.einsum("bnd,bmd->bnm",
                          q_h.astype(compute_dtype), k_h.astype(compute_dtype),
                          preferred_element_type=jnp.float32)   # (BT, N, N)
        m = jnp.max(dots, axis=-1, keepdims=True)
        p = jnp.exp(dots - m)                                   # f32 softmax
        l = jnp.sum(p, axis=-1, keepdims=True)
        if approx_recip:
            attn = p * pl.reciprocal(l, approx=True)            # EUP slot
        else:
            attn = p / l                                        # exact (f32 path)
        # TODO(synk): attention dropout omitted -- module default p=0.0 (identity).
        ctx = jnp.einsum("bnm,bmd->bnd",
                         attn.astype(compute_dtype), v_h.astype(compute_dtype),
                         preferred_element_type=jnp.float32)    # (BT, N, D)
        ctx_heads.append(ctx.reshape(R, head_dim))

    # Merge heads as a value concat (no scratch round-trip), then one
    # K=inner output-projection matmul on the MXU.
    merged = jnp.concatenate(ctx_heads, axis=-1).astype(compute_dtype)  # (R, inner)
    attn_out = jnp.dot(merged, wo_ref[...], preferred_element_type=jnp.float32)
    x = x + attn_out + bo_ref[...]                     # residual 1 (+ out-proj bias)
    # TODO(synk): to_out dropout omitted -- module default p=0.0 (identity).

    # ------------------- PreNorm + FeedForward -------------------
    xn2 = _layernorm(x, ln2g_ref[...], ln2b_ref[...], _LN_EPS).astype(compute_dtype)
    h1 = jnp.dot(xn2, w1_ref[...], preferred_element_type=jnp.float32) + b1_ref[...]
    h1 = _gelu_tanh(h1)                                # f32 activation
    y = jnp.dot(h1.astype(compute_dtype), w2_ref[...],
                preferred_element_type=jnp.float32) + b2_ref[...]
    # TODO(synk): FFN dropout omitted -- module default p=0.0 (identity).
    x = x + y                                          # residual 2

    o_ref[...] = x.reshape(BT, N, C).astype(o_ref.dtype)


# ---------------------------------------------------------------------------
# Wrapper helpers: generation-aware tiling / VMEM budgeting
# ---------------------------------------------------------------------------
def _vmem_capacity_bytes():
    try:
        return int(pltpu.get_tpu_info().vmem_capacity_bytes)
    except Exception:
        return 64 * 1024 * 1024  # v7x (smallest current generation) as conservative default


def _footprint_bytes(bt, N, C, inner, mlp, heads, cd_bytes, weight_buffers):
    """Rough per-grid-step VMEM footprint in bytes."""
    r = bt * N
    f32 = 4
    io = 2 * 2 * r * C * f32                                 # x + out blocks, double-buffered
    acts = f32 * (r * 3 * inner + r * mlp + r * inner + bt * heads * N * N + 3 * r * C)
    acts += cd_bytes * (r * 3 * inner + r * mlp + r * inner)
    wts = weight_buffers * cd_bytes * (3 * C * inner + inner * C + C * mlp + mlp * C)
    small = f32 * (8 * C + 2 * mlp)
    return io + acts + wts + small


def _pick_bt(B, N, C, inner, mlp, heads, cd_bytes, weight_buffers, vmem_budget):
    """Largest batch tile that (a) divides B, (b) fits the VMEM budget,
    (c) keeps >= 2 parallel grid steps when B >= 2 (v7x: 2 TensorCores),
    (d) keeps per-step row counts moderate."""
    divisors = [d for d in range(1, B + 1) if B % d == 0]
    fits = [d for d in divisors
            if _footprint_bytes(d, N, C, inner, mlp, heads, cd_bytes, weight_buffers) <= vmem_budget
            and d * N <= 4096]
    if not fits:
        fits = [1]
    two_step = [d for d in fits if B // d >= 2]
    return max(two_step) if two_step else max(fits)


def _transformer_layer(x, lp, *, heads, head_dim, compute_dtype):
    B, N, C = x.shape
    inner = heads * head_dim
    mlp = lp["w1"].shape[1]
    cd_bytes = jnp.dtype(compute_dtype).itemsize

    weight_bytes = cd_bytes * (3 * C * inner + inner * C + C * mlp + mlp * C)
    # Double-buffering tiny constant weights is harmless; single-buffer them
    # once they are big enough to eat into the activation-tile budget.
    single_buffer_weights = weight_bytes > (4 * 1024 * 1024)
    weight_buffers = 1 if single_buffer_weights else 2

    cap = _vmem_capacity_bytes()
    BT = _pick_bt(B, N, C, inner, mlp, heads, cd_bytes, weight_buffers,
                  vmem_budget=int(0.6 * cap))
    grid = (B // BT,)

    footprint = _footprint_bytes(BT, N, C, inner, mlp, heads, cd_bytes, weight_buffers)
    vmem_limit = int(min(0.9 * cap, max(32 * 1024 * 1024, 1.5 * footprint)))

    def _wspec(shape):
        if single_buffer_weights:
            return pl.BlockSpec(shape, lambda i: (0, 0), pipeline_mode=pl.Buffered(1))
        return pl.BlockSpec(shape, lambda i: (0, 0))

    kernel = functools.partial(
        _layer_kernel, heads=heads, head_dim=head_dim, compute_dtype=compute_dtype,
        approx_recip=(jnp.dtype(compute_dtype) != jnp.dtype(jnp.float32)))

    flops = (2 * B * N * C * 3 * inner                 # fused QKV projection
             + 4 * B * heads * N * N * head_dim        # scores + context
             + 2 * B * N * inner * C                   # output projection
             + 4 * B * N * C * mlp)                    # FFN matmuls
    transcendentals = B * heads * N * N + B * N * mlp  # softmax exp + GELU tanh
    bytes_accessed = 4 * (2 * B * N * C) + weight_bytes + 4 * (6 * C + mlp)

    return pl.pallas_call(
        kernel,
        out_shape=jax.ShapeDtypeStruct((B, N, C), x.dtype),
        grid_spec=pltpu.PrefetchScalarGridSpec(
            num_scalar_prefetch=0,
            grid=grid,
            in_specs=[
                pl.BlockSpec((BT, N, C), lambda i: (i, 0, 0)),  # x
                _wspec((1, C)),                                 # ln1 gamma
                _wspec((1, C)),                                 # ln1 beta
                _wspec((C, 3 * inner)),                         # w_qkv (Q cols pre-scaled)
                _wspec((inner, C)),                             # w_o
                _wspec((1, C)),                                 # b_o
                _wspec((1, C)),                                 # ln2 gamma
                _wspec((1, C)),                                 # ln2 beta
                _wspec((C, mlp)),                               # w1
                _wspec((1, mlp)),                               # b1
                _wspec((mlp, C)),                               # w2
                _wspec((1, C)),                                 # b2
            ],
            out_specs=pl.BlockSpec((BT, N, C), lambda i: (i, 0, 0)),
        ),
        compiler_params=pltpu.CompilerParams(
            dimension_semantics=("parallel",),
            vmem_limit_bytes=vmem_limit),
        cost_estimate=pl.CostEstimate(flops=int(flops),
                                      transcendentals=int(transcendentals),
                                      bytes_accessed=int(bytes_accessed)),
    )(x, lp["ln1_g"], lp["ln1_b"], lp["w_qkv"], lp["w_o"], lp["b_o"],
      lp["ln2_g"], lp["ln2_b"], lp["w1"], lp["b1"], lp["w2"], lp["b2"])


# ---------------------------------------------------------------------------
# Parameter preparation (hoisted out of the forward path: done once)
# ---------------------------------------------------------------------------
def prepare_params(params, *, heads, head_dim, compute_dtype):
    inner = heads * head_dim
    scale = float(head_dim) ** -0.5
    prepared = []
    for p in params:
        # Fold the softmax scale into the Q columns of the fused QKV weight.
        wqkv = jnp.concatenate([p["w_qkv"][:, :inner] * scale,
                                p["w_qkv"][:, inner:]], axis=1)
        prepared.append({
            "ln1_g": p["ln1_g"], "ln1_b": p["ln1_b"],
            "w_qkv": wqkv.astype(compute_dtype),
            "w_o": p["w_o"].astype(compute_dtype), "b_o": p["b_o"],
            "ln2_g": p["ln2_g"], "ln2_b": p["ln2_b"],
            "w1": p["w1"].astype(compute_dtype), "b1": p["b1"],
            "w2": p["w2"].astype(compute_dtype), "b2": p["b2"],
        })
    return prepared


def transformer_forward(x, prepared_params, *, heads, head_dim,
                        compute_dtype=jnp.bfloat16):
    for lp in prepared_params:
        x = _transformer_layer(x, lp, heads=heads, head_dim=head_dim,
                               compute_dtype=compute_dtype)
    return x


# ---------------------------------------------------------------------------
# Pure-JAX reference (mirrors the PyTorch module, tanh-GELU variant)
# ---------------------------------------------------------------------------
def _reference(x, params, *, heads, head_dim):
    scale = float(head_dim) ** -0.5
    B, N, C = x.shape
    inner = heads * head_dim
    for p in params:
        y = _layernorm(x, p["ln1_g"], p["ln1_b"], _LN_EPS)
        qkv = y @ p["w_qkv"]
        q, k, v = qkv[..., :inner], qkv[..., inner:2 * inner], qkv[..., 2 * inner:]

        def split(t):
            return t.reshape(B, N, heads, head_dim).transpose(0, 2, 1, 3)

        qh, kh, vh = split(q), split(k), split(v)
        dots = jnp.einsum("bhnd,bhmd->bhnm", qh, kh) * scale
        attn = jax.nn.softmax(dots, axis=-1)
        o = jnp.einsum("bhnm,bhmd->bhnd", attn, vh)
        o = o.transpose(0, 2, 1, 3).reshape(B, N, inner)
        x = o @ p["w_o"] + p["b_o"] + x

        y = _layernorm(x, p["ln2_g"], p["ln2_b"], _LN_EPS)
        h = _gelu_tanh(y @ p["w1"] + p["b1"])
        x = h @ p["w2"] + p["b2"] + x
    return x


def _init_params(key, *, depth, hid, heads, head_dim, mlp):
    inner = heads * head_dim

    def uni(k, shape, fan_in):
        b = 1.0 / math.sqrt(fan_in)
        return jax.random.uniform(k, shape, jnp.float32, minval=-b, maxval=b)

    params = []
    for _ in range(depth):
        key, *ks = jax.random.split(key, 12)
        params.append({
            "ln1_g": 1.0 + 0.1 * jax.random.normal(ks[0], (1, hid), jnp.float32),
            "ln1_b": 0.1 * jax.random.normal(ks[1], (1, hid), jnp.float32),
            "w_qkv": uni(ks[2], (hid, 3 * inner), hid),      # to_qkv (bias=False)
            "w_o": uni(ks[3], (inner, hid), inner),
            "b_o": uni(ks[4], (1, hid), inner),
            "ln2_g": 1.0 + 0.1 * jax.random.normal(ks[5], (1, hid), jnp.float32),
            "ln2_b": 0.1 * jax.random.normal(ks[6], (1, hid), jnp.float32),
            "w1": uni(ks[7], (hid, mlp), hid),
            "b1": uni(ks[8], (1, mlp), hid),
            "w2": uni(ks[9], (mlp, hid), mlp),
            "b2": uni(ks[10], (1, hid), mlp),
        })
    return params


if __name__ == "__main__":
    # Small shapes consistent with the module: batch=2, tokens=8, hid_channels=32,
    # heads=4, head_channels=8 (inner=32, project_out=True), mlp_channels=64, depth=2.
    B, N, HID = 2, 8, 32
    HEADS, HEAD_DIM = 4, 8
    MLP = 64
    DEPTH = 2

    root = jax.random.PRNGKey(0)
    k_x, k_p = jax.random.split(root)
    x = jax.random.normal(k_x, (B, N, HID), dtype=jnp.float32)
    params = _init_params(k_p, depth=DEPTH, hid=HID, heads=HEADS,
                          head_dim=HEAD_DIM, mlp=MLP)

    y_ref = _reference(x, params, heads=HEADS, head_dim=HEAD_DIM)

    # f32 matmul-operand path (tight structural check, exact softmax divide).
    prep_f32 = prepare_params(params, heads=HEADS, head_dim=HEAD_DIM,
                              compute_dtype=jnp.float32)
    y_f32 = jax.block_until_ready(
        transformer_forward(x, prep_f32, heads=HEADS, head_dim=HEAD_DIM,
                            compute_dtype=jnp.float32))
    assert y_f32.shape == (B, N, HID)
    assert jnp.allclose(y_f32, y_ref, atol=5e-3, rtol=5e-3), "f32 kernel mismatch"

    # bf16 matmul operands with f32 accumulation (recommended on v6e/v7x).
    prep_bf16 = prepare_params(params, heads=HEADS, head_dim=HEAD_DIM,
                               compute_dtype=jnp.bfloat16)
    y_bf16 = jax.block_until_ready(
        transformer_forward(x, prep_bf16, heads=HEADS, head_dim=HEAD_DIM,
                            compute_dtype=jnp.bfloat16))
    assert jnp.allclose(y_bf16, y_ref, atol=8e-2, rtol=8e-2), "bf16 kernel mismatch"

    print("KERNEL_OK")
</pallas_src>

<mosaic_0001>
module attributes {stable_mosaic.version = 11 : i64} {
  func.func @_layer_kernel(%arg0: i32, %arg1: memref<1x8x32xf32, #tpu.memory_space<vmem>>, %arg2: memref<1x32xf32, #tpu.memory_space<vmem>>, %arg3: memref<1x32xf32, #tpu.memory_space<vmem>>, %arg4: memref<32x96xf32, #tpu.memory_space<vmem>>, %arg5: memref<32x32xf32, #tpu.memory_space<vmem>>, %arg6: memref<1x32xf32, #tpu.memory_space<vmem>>, %arg7: memref<1x32xf32, #tpu.memory_space<vmem>>, %arg8: memref<1x32xf32, #tpu.memory_space<vmem>>, %arg9: memref<32x64xf32, #tpu.memory_space<vmem>>, %arg10: memref<1x64xf32, #tpu.memory_space<vmem>>, %arg11: memref<64x32xf32, #tpu.memory_space<vmem>>, %arg12: memref<1x32xf32, #tpu.memory_space<vmem>>, %arg13: memref<1x8x32xf32, #tpu.memory_space<vmem>>) attributes {dimension_semantics = [#tpu.dimension_semantics<parallel>], iteration_bounds = array<i64: 2>, scalar_prefetch = 0 : i64, scratch_operands = 0 : i64, tpu.core_type = #tpu.core_type<tc>, window_params = [{transform_indices = @transform_0, window_bounds = array<i64: 1, 8, 32>}, {pipeline_mode = #tpu.pipeline_mode<synchronous>, transform_indices = @transform_1, window_bounds = array<i64: 1, 32>}, {pipeline_mode = #tpu.pipeline_mode<synchronous>, transform_indices = @transform_2, window_bounds = array<i64: 1, 32>}, {pipeline_mode = #tpu.pipeline_mode<synchronous>, transform_indices = @transform_3, window_bounds = array<i64: 32, 96>}, {pipeline_mode = #tpu.pipeline_mode<synchronous>, transform_indices = @transform_4, window_bounds = array<i64: 32, 32>}, {pipeline_mode = #tpu.pipeline_mode<synchronous>, transform_indices = @transform_5, window_bounds = array<i64: 1, 32>}, {pipeline_mode = #tpu.pipeline_mode<synchronous>, transform_indices = @transform_6, window_bounds = array<i64: 1, 32>}, {pipeline_mode = #tpu.pipeline_mode<synchronous>, transform_indices = @transform_7, window_bounds = array<i64: 1, 32>}, {pipeline_mode = #tpu.pipeline_mode<synchronous>, transform_indices = @transform_8, window_bounds = array<i64: 32, 64>}, {pipeline_mode = #tpu.pipeline_mode<synchronous>, transform_indices = @transform_9, window_bounds = array<i64: 1, 64>}, {pipeline_mode = #tpu.pipeline_mode<synchronous>, transform_indices = @transform_10, window_bounds = array<i64: 64, 32>}, {pipeline_mode = #tpu.pipeline_mode<synchronous>, transform_indices = @transform_11, window_bounds = array<i64: 1, 32>}, {transform_indices = @transform_12, window_bounds = array<i64: 1, 8, 32>}]} {
    %c0 = arith.constant 0 : index
    %c0_0 = arith.constant 0 : index
    %c0_1 = arith.constant 0 : index
    %0 = vector.load %arg1[%c0, %c0_0, %c0_1] : memref<1x8x32xf32, #tpu.memory_space<vmem>>, vector<1x8x32xf32>
    %1 = vector.shape_cast %0 : vector<1x8x32xf32> to vector<8x32xf32>
    %c0_2 = arith.constant 0 : index
    %c0_3 = arith.constant 0 : index
    %2 = vector.load %arg2[%c0_2, %c0_3] : memref<1x32xf32, #tpu.memory_space<vmem>>, vector<1x32xf32>
    %c0_4 = arith.constant 0 : index
    %c0_5 = arith.constant 0 : index
    %3 = vector.load %arg3[%c0_4, %c0_5] : memref<1x32xf32, #tpu.memory_space<vmem>>, vector<1x32xf32>
    %cst = arith.constant dense<0.000000e+00> : vector<8xf32>
    %4 = vector.multi_reduction <add>, %1, %cst [1] : vector<8x32xf32> to vector<8xf32>
    %5 = vector.shape_cast %4 : vector<8xf32> to vector<8x1xf32>
    %cst_6 = arith.constant 3.200000e+01 : f32
    %6 = vector.broadcast %cst_6 : f32 to vector<8x1xf32>
    %7 = arith.divf %5, %6 : vector<8x1xf32>
    %8 = vector.broadcast %7 : vector<8x1xf32> to vector<8x32xf32>
    %9 = arith.subf %1, %8 : vector<8x32xf32>
    %10 = arith.mulf %9, %9 : vector<8x32xf32>
    %cst_7 = arith.constant dense<0.000000e+00> : vector<8xf32>
    %11 = vector.multi_reduction <add>, %10, %cst_7 [1] : vector<8x32xf32> to vector<8xf32>
    %12 = vector.shape_cast %11 : vector<8xf32> to vector<8x1xf32>
    %cst_8 = arith.constant 3.200000e+01 : f32
    %13 = vector.broadcast %cst_8 : f32 to vector<8x1xf32>
    %14 = arith.divf %12, %13 : vector<8x1xf32>
    %cst_9 = arith.constant 9.99999974E-6 : f32
    %15 = vector.broadcast %cst_9 : f32 to vector<8x1xf32>
    %16 = arith.addf %14, %15 : vector<8x1xf32>
    %17 = math.rsqrt %16 : vector<8x1xf32>
    %18 = vector.broadcast %17 : vector<8x1xf32> to vector<8x32xf32>
    %19 = arith.mulf %9, %18 : vector<8x32xf32>
    %20 = vector.broadcast %2 : vector<1x32xf32> to vector<8x32xf32>
    %21 = arith.mulf %19, %20 : vector<8x32xf32>
    %22 = vector.broadcast %3 : vector<1x32xf32> to vector<8x32xf32>
    %23 = arith.addf %21, %22 : vector<8x32xf32>
    %c0_10 = arith.constant 0 : index
    %c0_11 = arith.constant 0 : index
    %24 = vector.load %arg4[%c0_10, %c0_11] : memref<32x96xf32, #tpu.memory_space<vmem>>, vector<32x96xf32>
    %cst_12 = arith.constant dense<0.000000e+00> : vector<8x96xf32>
    %25 = tpu.matmul %23, %24, %cst_12 {dimension_numbers = #tpu.dot_dimension_numbers<[1], [0], [0], [1], [0, 0, 1, 1], [], []>} : vector<8x32xf32>, vector<32x96xf32>, vector<8x96xf32> -> vector<8x96xf32>
    %26 = vector.extract_strided_slice %25 {offsets = [0, 0], sizes = [8, 8], strides = [1, 1]} : vector<8x96xf32> to vector<8x8xf32>
    %27 = vector.shape_cast %26 : vector<8x8xf32> to vector<1x8x8xf32>
    %28 = vector.extract_strided_slice %25 {offsets = [0, 32], sizes = [8, 8], strides = [1, 1]} : vector<8x96xf32> to vector<8x8xf32>
    %29 = vector.shape_cast %28 : vector<8x8xf32> to vector<1x8x8xf32>
    %30 = vector.extract_strided_slice %25 {offsets = [0, 64], sizes = [8, 8], strides = [1, 1]} : vector<8x96xf32> to vector<8x8xf32>
    %31 = vector.shape_cast %30 : vector<8x8xf32> to vector<1x8x8xf32>
    "tpu.trace_start"() <{level = 10 : i32, message = "bnd,bmd->bnm"}> : () -> ()
    %cst_13 = arith.constant dense<0.000000e+00> : vector<1x8x8xf32>
    %32 = tpu.matmul %27, %29, %cst_13 {dimension_numbers = #tpu.dot_dimension_numbers<[2], [2], [1], [1], [0, 0, 0, 1, 1, 1], [0], [0]>} : vector<1x8x8xf32>, vector<1x8x8xf32>, vector<1x8x8xf32> -> vector<1x8x8xf32>
    "tpu.trace_stop"() : () -> ()
    %cst_14 = arith.constant dense<0xFF800000> : vector<1x8xf32>
    %33 = vector.multi_reduction <maximumf>, %32, %cst_14 [2] : vector<1x8x8xf32> to vector<1x8xf32>
    %34 = vector.shape_cast %33 : vector<1x8xf32> to vector<1x8x1xf32>
    %35 = vector.broadcast %34 : vector<1x8x1xf32> to vector<1x8x8xf32>
    %36 = arith.subf %32, %35 : vector<1x8x8xf32>
    %37 = math.exp %36 : vector<1x8x8xf32>
    %cst_15 = arith.constant dense<0.000000e+00> : vector<1x8xf32>
    %38 = vector.multi_reduction <add>, %37, %cst_15 [2] : vector<1x8x8xf32> to vector<1x8xf32>
    %39 = vector.shape_cast %38 : vector<1x8xf32> to vector<1x8x1xf32>
    %40 = vector.broadcast %39 : vector<1x8x1xf32> to vector<1x8x8xf32>
    %41 = arith.divf %37, %40 : vector<1x8x8xf32>
    "tpu.trace_start"() <{level = 10 : i32, message = "bnm,bmd->bnd"}> : () -> ()
    %cst_16 = arith.constant dense<0.000000e+00> : vector<1x8x8xf32>
    %42 = tpu.matmul %41, %31, %cst_16 {dimension_numbers = #tpu.dot_dimension_numbers<[2], [1], [1], [2], [0, 0, 0, 1, 1, 2], [0], [0]>} : vector<1x8x8xf32>, vector<1x8x8xf32>, vector<1x8x8xf32> -> vector<1x8x8xf32>
    "tpu.trace_stop"() : () -> ()
    %43 = vector.shape_cast %42 : vector<1x8x8xf32> to vector<8x8xf32>
    %44 = vector.extract_strided_slice %25 {offsets = [0, 8], sizes = [8, 8], strides = [1, 1]} : vector<8x96xf32> to vector<8x8xf32>
    %45 = vector.shape_cast %44 : vector<8x8xf32> to vector<1x8x8xf32>
    %46 = vector.extract_strided_slice %25 {offsets = [0, 40], sizes = [8, 8], strides = [1, 1]} : vector<8x96xf32> to vector<8x8xf32>
    %47 = vector.shape_cast %46 : vector<8x8xf32> to vector<1x8x8xf32>
    %48 = vector.extract_strided_slice %25 {offsets = [0, 72], sizes = [8, 8], strides = [1, 1]} : vector<8x96xf32> to vector<8x8xf32>
    %49 = vector.shape_cast %48 : vector<8x8xf32> to vector<1x8x8xf32>
    "tpu.trace_start"() <{level = 10 : i32, message = "bnd,bmd->bnm"}> : () -> ()
    %cst_17 = arith.constant dense<0.000000e+00> : vector<1x8x8xf32>
    %50 = tpu.matmul %45, %47, %cst_17 {dimension_numbers = #tpu.dot_dimension_numbers<[2], [2], [1], [1], [0, 0, 0, 1, 1, 1], [0], [0]>} : vector<1x8x8xf32>, vector<1x8x8xf32>, vector<1x8x8xf32> -> vector<1x8x8xf32>
    "tpu.trace_stop"() : () -> ()
    %cst_18 = arith.constant dense<0xFF800000> : vector<1x8xf32>
    %51 = vector.multi_reduction <maximumf>, %50, %cst_18 [2] : vector<1x8x8xf32> to vector<1x8xf32>
    %52 = vector.shape_cast %51 : vector<1x8xf32> to vector<1x8x1xf32>
    %53 = vector.broadcast %52 : vector<1x8x1xf32> to vector<1x8x8xf32>
    %54 = arith.subf %50, %53 : vector<1x8x8xf32>
    %55 = math.exp %54 : vector<1x8x8xf32>
    %cst_19 = arith.constant dense<0.000000e+00> : vector<1x8xf32>
    %56 = vector.multi_reduction <add>, %55, %cst_19 [2] : vector<1x8x8xf32> to vector<1x8xf32>
    %57 = vector.shape_cast %56 : vector<1x8xf32> to vector<1x8x1xf32>
    %58 = vector.broadcast %57 : vector<1x8x1xf32> to vector<1x8x8xf32>
    %59 = arith.divf %55, %58 : vector<1x8x8xf32>
    "tpu.trace_start"() <{level = 10 : i32, message = "bnm,bmd->bnd"}> : () -> ()
    %cst_20 = arith.constant dense<0.000000e+00> : vector<1x8x8xf32>
    %60 = tpu.matmul %59, %49, %cst_20 {dimension_numbers = #tpu.dot_dimension_numbers<[2], [1], [1], [2], [0, 0, 0, 1, 1, 2], [0], [0]>} : vector<1x8x8xf32>, vector<1x8x8xf32>, vector<1x8x8xf32> -> vector<1x8x8xf32>
    "tpu.trace_stop"() : () -> ()
    %61 = vector.shape_cast %60 : vector<1x8x8xf32> to vector<8x8xf32>
    %62 = vector.extract_strided_slice %25 {offsets = [0, 16], sizes = [8, 8], strides = [1, 1]} : vector<8x96xf32> to vector<8x8xf32>
    %63 = vector.shape_cast %62 : vector<8x8xf32> to vector<1x8x8xf32>
    %64 = vector.extract_strided_slice %25 {offsets = [0, 48], sizes = [8, 8], strides = [1, 1]} : vector<8x96xf32> to vector<8x8xf32>
    %65 = vector.shape_cast %64 : vector<8x8xf32> to vector<1x8x8xf32>
    %66 = vector.extract_strided_slice %25 {offsets = [0, 80], sizes = [8, 8], strides = [1, 1]} : vector<8x96xf32> to vector<8x8xf32>
    %67 = vector.shape_cast %66 : vector<8x8xf32> to vector<1x8x8xf32>
    "tpu.trace_start"() <{level = 10 : i32, message = "bnd,bmd->bnm"}> : () -> ()
    %cst_21 = arith.constant dense<0.000000e+00> : vector<1x8x8xf32>
    %68 = tpu.matmul %63, %65, %cst_21 {dimension_numbers = #tpu.dot_dimension_numbers<[2], [2], [1], [1], [0, 0, 0, 1, 1, 1], [0], [0]>} : vector<1x8x8xf32>, vector<1x8x8xf32>, vector<1x8x8xf32> -> vector<1x8x8xf32>
    "tpu.trace_stop"() : () -> ()
    %cst_22 = arith.constant dense<0xFF800000> : vector<1x8xf32>
    %69 = vector.multi_reduction <maximumf>, %68, %cst_22 [2] : vector<1x8x8xf32> to vector<1x8xf32>
    %70 = vector.shape_cast %69 : vector<1x8xf32> to vector<1x8x1xf32>
    %71 = vector.broadcast %70 : vector<1x8x1xf32> to vector<1x8x8xf32>
    %72 = arith.subf %68, %71 : vector<1x8x8xf32>
    %73 = math.exp %72 : vector<1x8x8xf32>
    %cst_23 = arith.constant dense<0.000000e+00> : vector<1x8xf32>
    %74 = vector.multi_reduction <add>, %73, %cst_23 [2] : vector<1x8x8xf32> to vector<1x8xf32>
    %75 = vector.shape_cast %74 : vector<1x8xf32> to vector<1x8x1xf32>
    %76 = vector.broadcast %75 : vector<1x8x1xf32> to vector<1x8x8xf32>
    %77 = arith.divf %73, %76 : vector<1x8x8xf32>
    "tpu.trace_start"() <{level = 10 : i32, message = "bnm,bmd->bnd"}> : () -> ()
    %cst_24 = arith.constant dense<0.000000e+00> : vector<1x8x8xf32>
    %78 = tpu.matmul %77, %67, %cst_24 {dimension_numbers = #tpu.dot_dimension_numbers<[2], [1], [1], [2], [0, 0, 0, 1, 1, 2], [0], [0]>} : vector<1x8x8xf32>, vector<1x8x8xf32>, vector<1x8x8xf32> -> vector<1x8x8xf32>
    "tpu.trace_stop"() : () -> ()
    %79 = vector.shape_cast %78 : vector<1x8x8xf32> to vector<8x8xf32>
    %80 = vector.extract_strided_slice %25 {offsets = [0, 24], sizes = [8, 8], strides = [1, 1]} : vector<8x96xf32> to vector<8x8xf32>
    %81 = vector.shape_cast %80 : vector<8x8xf32> to vector<1x8x8xf32>
    %82 = vector.extract_strided_slice %25 {offsets = [0, 56], sizes = [8, 8], strides = [1, 1]} : vector<8x96xf32> to vector<8x8xf32>
    %83 = vector.shape_cast %82 : vector<8x8xf32> to vector<1x8x8xf32>
    %84 = vector.extract_strided_slice %25 {offsets = [0, 88], sizes = [8, 8], strides = [1, 1]} : vector<8x96xf32> to vector<8x8xf32>
    %85 = vector.shape_cast %84 : vector<8x8xf32> to vector<1x8x8xf32>
    "tpu.trace_start"() <{level = 10 : i32, message = "bnd,bmd->bnm"}> : () -> ()
    %cst_25 = arith.constant dense<0.000000e+00> : vector<1x8x8xf32>
    %86 = tpu.matmul %81, %83, %cst_25 {dimension_numbers = #tpu.dot_dimension_numbers<[2], [2], [1], [1], [0, 0, 0, 1, 1, 1], [0], [0]>} : vector<1x8x8xf32>, vector<1x8x8xf32>, vector<1x8x8xf32> -> vector<1x8x8xf32>
    "tpu.trace_stop"() : () -> ()
    %cst_26 = arith.constant dense<0xFF800000> : vector<1x8xf32>
    %87 = vector.multi_reduction <maximumf>, %86, %cst_26 [2] : vector<1x8x8xf32> to vector<1x8xf32>
    %88 = vector.shape_cast %87 : vector<1x8xf32> to vector<1x8x1xf32>
    %89 = vector.broadcast %88 : vector<1x8x1xf32> to vector<1x8x8xf32>
    %90 = arith.subf %86, %89 : vector<1x8x8xf32>
    %91 = math.exp %90 : vector<1x8x8xf32>
    %cst_27 = arith.constant dense<0.000000e+00> : vector<1x8xf32>
    %92 = vector.multi_reduction <add>, %91, %cst_27 [2] : vector<1x8x8xf32> to vector<1x8xf32>
    %93 = vector.shape_cast %92 : vector<1x8xf32> to vector<1x8x1xf32>
    %94 = vector.broadcast %93 : vector<1x8x1xf32> to vector<1x8x8xf32>
    %95 = arith.divf %91, %94 : vector<1x8x8xf32>
    "tpu.trace_start"() <{level = 10 : i32, message = "bnm,bmd->bnd"}> : () -> ()
    %cst_28 = arith.constant dense<0.000000e+00> : vector<1x8x8xf32>
    %96 = tpu.matmul %95, %85, %cst_28 {dimension_numbers = #tpu.dot_dimension_numbers<[2], [1], [1], [2], [0, 0, 0, 1, 1, 2], [0], [0]>} : vector<1x8x8xf32>, vector<1x8x8xf32>, vector<1x8x8xf32> -> vector<1x8x8xf32>
    "tpu.trace_stop"() : () -> ()
    %97 = vector.shape_cast %96 : vector<1x8x8xf32> to vector<8x8xf32>
    %98 = tpu.concatenate %43, %61, %79, %97 in 1 : vector<8x8xf32>, vector<8x8xf32>, vector<8x8xf32>, vector<8x8xf32> -> vector<8x32xf32>
    %c0_29 = arith.constant 0 : index
    %c0_30 = arith.constant 0 : index
    %99 = vector.load %arg5[%c0_29, %c0_30] : memref<32x32xf32, #tpu.memory_space<vmem>>, vector<32x32xf32>
    %cst_31 = arith.constant dense<0.000000e+00> : vector<8x32xf32>
    %100 = tpu.matmul %98, %99, %cst_31 {dimension_numbers = #tpu.dot_dimension_numbers<[1], [0], [0], [1], [0, 0, 1, 1], [], []>} : vector<8x32xf32>, vector<32x32xf32>, vector<8x32xf32> -> vector<8x32xf32>
    %101 = arith.addf %1, %100 : vector<8x32xf32>
    %c0_32 = arith.constant 0 : index
    %c0_33 = arith.constant 0 : index
    %102 = vector.load %arg6[%c0_32, %c0_33] : memref<1x32xf32, #tpu.memory_space<vmem>>, vector<1x32xf32>
    %103 = vector.broadcast %102 : vector<1x32xf32> to vector<8x32xf32>
    %104 = arith.addf %101, %103 : vector<8x32xf32>
    %c0_34 = arith.constant 0 : index
    %c0_35 = arith.constant 0 : index
    %105 = vector.load %arg7[%c0_34, %c0_35] : memref<1x32xf32, #tpu.memory_space<vmem>>, vector<1x32xf32>
    %c0_36 = arith.constant 0 : index
    %c0_37 = arith.constant 0 : index
    %106 = vector.load %arg8[%c0_36, %c0_37] : memref<1x32xf32, #tpu.memory_space<vmem>>, vector<1x32xf32>
    %cst_38 = arith.constant dense<0.000000e+00> : vector<8xf32>
    %107 = vector.multi_reduction <add>, %104, %cst_38 [1] : vector<8x32xf32> to vector<8xf32>
    %108 = vector.shape_cast %107 : vector<8xf32> to vector<8x1xf32>
    %cst_39 = arith.constant 3.200000e+01 : f32
    %109 = vector.broadcast %cst_39 : f32 to vector<8x1xf32>
    %110 = arith.divf %108, %109 : vector<8x1xf32>
    %111 = vector.broadcast %110 : vector<8x1xf32> to vector<8x32xf32>
    %112 = arith.subf %104, %111 : vector<8x32xf32>
    %113 = arith.mulf %112, %112 : vector<8x32xf32>
    %cst_40 = arith.constant dense<0.000000e+00> : vector<8xf32>
    %114 = vector.multi_reduction <add>, %113, %cst_40 [1] : vector<8x32xf32> to vector<8xf32>
    %115 = vector.shape_cast %114 : vector<8xf32> to vector<8x1xf32>
    %cst_41 = arith.constant 3.200000e+01 : f32
    %116 = vector.broadcast %cst_41 : f32 to vector<8x1xf32>
    %117 = arith.divf %115, %116 : vector<8x1xf32>
    %cst_42 = arith.constant 9.99999974E-6 : f32
    %118 = vector.broadcast %cst_42 : f32 to vector<8x1xf32>
    %119 = arith.addf %117, %118 : vector<8x1xf32>
    %120 = math.rsqrt %119 : vector<8x1xf32>
    %121 = vector.broadcast %120 : vector<8x1xf32> to vector<8x32xf32>
    %122 = arith.mulf %112, %121 : vector<8x32xf32>
    %123 = vector.broadcast %105 : vector<1x32xf32> to vector<8x32xf32>
    %124 = arith.mulf %122, %123 : vector<8x32xf32>
    %125 = vector.broadcast %106 : vector<1x32xf32> to vector<8x32xf32>
    %126 = arith.addf %124, %125 : vector<8x32xf32>
    %c0_43 = arith.constant 0 : index
    %c0_44 = arith.constant 0 : index
    %127 = vector.load %arg9[%c0_43, %c0_44] : memref<32x64xf32, #tpu.memory_space<vmem>>, vector<32x64xf32>
    %cst_45 = arith.constant dense<0.000000e+00> : vector<8x64xf32>
    %128 = tpu.matmul %126, %127, %cst_45 {dimension_numbers = #tpu.dot_dimension_numbers<[1], [0], [0], [1], [0, 0, 1, 1], [], []>} : vector<8x32xf32>, vector<32x64xf32>, vector<8x64xf32> -> vector<8x64xf32>
    %c0_46 = arith.constant 0 : index
    %c0_47 = arith.constant 0 : index
    %129 = vector.load %arg10[%c0_46, %c0_47] : memref<1x64xf32, #tpu.memory_space<vmem>>, vector<1x64xf32>
    %130 = vector.broadcast %129 : vector<1x64xf32> to vector<8x64xf32>
    %131 = arith.addf %128, %130 : vector<8x64xf32>
    %cst_48 = arith.constant 5.000000e-01 : f32
    %132 = vector.broadcast %cst_48 : f32 to vector<8x64xf32>
    %133 = arith.mulf %132, %131 : vector<8x64xf32>
    %134 = arith.mulf %131, %131 : vector<8x64xf32>
    %135 = arith.mulf %134, %131 : vector<8x64xf32>
    %cst_49 = arith.constant 4.471500e-02 : f32
    %136 = vector.broadcast %cst_49 : f32 to vector<8x64xf32>
    %137 = arith.mulf %136, %135 : vector<8x64xf32>
    %138 = arith.addf %131, %137 : vector<8x64xf32>
    %cst_50 = arith.constant 0.797884583 : f32
    %139 = vector.broadcast %cst_50 : f32 to vector<8x64xf32>
    %140 = arith.mulf %139, %138 : vector<8x64xf32>
    %141 = math.tanh %140 : vector<8x64xf32>
    %cst_51 = arith.constant 1.000000e+00 : f32
    %142 = vector.broadcast %cst_51 : f32 to vector<8x64xf32>
    %143 = arith.addf %142, %141 : vector<8x64xf32>
    %144 = arith.mulf %133, %143 : vector<8x64xf32>
    %c0_52 = arith.constant 0 : index
    %c0_53 = arith.constant 0 : index
    %145 = vector.load %arg11[%c0_52, %c0_53] : memref<64x32xf32, #tpu.memory_space<vmem>>, vector<64x32xf32>
    %cst_54 = arith.constant dense<0.000000e+00> : vector<8x32xf32>
    %146 = tpu.matmul %144, %145, %cst_54 {dimension_numbers = #tpu.dot_dimension_numbers<[1], [0], [0], [1], [0, 0, 1, 1], [], []>} : vector<8x64xf32>, vector<64x32xf32>, vector<8x32xf32> -> vector<8x32xf32>
    %c0_55 = arith.constant 0 : index
    %c0_56 = arith.constant 0 : index
    %147 = vector.load %arg12[%c0_55, %c0_56] : memref<1x32xf32, #tpu.memory_space<vmem>>, vector<1x32xf32>
    %148 = vector.broadcast %147 : vector<1x32xf32> to vector<8x32xf32>
    %149 = arith.addf %146, %148 : vector<8x32xf32>
    %150 = arith.addf %104, %149 : vector<8x32xf32>
    %151 = vector.shape_cast %150 : vector<8x32xf32> to vector<1x8x32xf32>
    %c0_57 = arith.constant 0 : index
    %c0_58 = arith.constant 0 : index
    %c0_59 = arith.constant 0 : index
    %152 = vector.load %arg13[%c0_57, %c0_58, %c0_59] : memref<1x8x32xf32, #tpu.memory_space<vmem>>, vector<1x8x32xf32>
    tpu.vector_store %arg13[%c0_57, %c0_58, %c0_59], %151 {strides = array<i32>} : memref<1x8x32xf32, #tpu.memory_space<vmem>>, vector<1x8x32xf32>,
    return
  }
  func.func @transform_0(%arg0: i32) -> (i32, i32, i32) {
    %c0_i32 = arith.constant 0 : i32
    %c0_i32_0 = arith.constant 0 : i32
    %c0_i32_1 = arith.constant 0 : i32
    return %arg0, %c0_i32, %c0_i32_0 : i32, i32, i32
  }
  func.func @transform_1(%arg0: i32) -> (i32, i32) {
    %c0_i32 = arith.constant 0 : i32
    %c0_i32_0 = arith.constant 0 : i32
    %c0_i32_1 = arith.constant 0 : i32
    return %c0_i32, %c0_i32_0 : i32, i32
  }
  func.func @transform_2(%arg0: i32) -> (i32, i32) {
    %c0_i32 = arith.constant 0 : i32
    %c0_i32_0 = arith.constant 0 : i32
    %c0_i32_1 = arith.constant 0 : i32
    return %c0_i32, %c0_i32_0 : i32, i32
  }
  func.func @transform_3(%arg0: i32) -> (i32, i32) {
    %c0_i32 = arith.constant 0 : i32
    %c0_i32_0 = arith.constant 0 : i32
    %c0_i32_1 = arith.constant 0 : i32
    return %c0_i32, %c0_i32_0 : i32, i32
  }
  func.func @transform_4(%arg0: i32) -> (i32, i32) {
    %c0_i32 = arith.constant 0 : i32
    %c0_i32_0 = arith.constant 0 : i32
    %c0_i32_1 = arith.constant 0 : i32
    return %c0_i32, %c0_i32_0 : i32, i32
  }
  func.func @transform_5(%arg0: i32) -> (i32, i32) {
    %c0_i32 = arith.constant 0 : i32
    %c0_i32_0 = arith.constant 0 : i32
    %c0_i32_1 = arith.constant 0 : i32
    return %c0_i32, %c0_i32_0 : i32, i32
  }
  func.func @transform_6(%arg0: i32) -> (i32, i32) {
    %c0_i32 = arith.constant 0 : i32
    %c0_i32_0 = arith.constant 0 : i32
    %c0_i32_1 = arith.constant 0 : i32
    return %c0_i32, %c0_i32_0 : i32, i32
  }
  func.func @transform_7(%arg0: i32) -> (i32, i32) {
    %c0_i32 = arith.constant 0 : i32
    %c0_i32_0 = arith.constant 0 : i32
    %c0_i32_1 = arith.constant 0 : i32
    return %c0_i32, %c0_i32_0 : i32, i32
  }
  func.func @transform_8(%arg0: i32) -> (i32, i32) {
    %c0_i32 = arith.constant 0 : i32
    %c0_i32_0 = arith.constant 0 : i32
    %c0_i32_1 = arith.constant 0 : i32
    return %c0_i32, %c0_i32_0 : i32, i32
  }
  func.func @transform_9(%arg0: i32) -> (i32, i32) {
    %c0_i32 = arith.constant 0 : i32
    %c0_i32_0 = arith.constant 0 : i32
    %c0_i32_1 = arith.constant 0 : i32
    return %c0_i32, %c0_i32_0 : i32, i32
  }
  func.func @transform_10(%arg0: i32) -> (i32, i32) {
    %c0_i32 = arith.constant 0 : i32
    %c0_i32_0 = arith.constant 0 : i32
    %c0_i32_1 = arith.constant 0 : i32
    return %c0_i32, %c0_i32_0 : i32, i32
  }
  func.func @transform_11(%arg0: i32) -> (i32, i32) {
    %c0_i32 = arith.constant 0 : i32
    %c0_i32_0 = arith.constant 0 : i32
    %c0_i32_1 = arith.constant 0 : i32
    return %c0_i32, %c0_i32_0 : i32, i32
  }
  func.func @transform_12(%arg0: i32) -> (i32, i32, i32) {
    %c0_i32 = arith.constant 0 : i32
    %c0_i32_0 = arith.constant 0 : i32
    %c0_i32_1 = arith.constant 0 : i32
    return %arg0, %c0_i32, %c0_i32_0 : i32, i32, i32
  }
}

</mosaic_0001>

<bundles_post_ra>
// kernel: tpu_custom_call.1
= control target key start
LH: loop header
LB: loop body
LE: loop exit
PB: predicated region body
PF: predicated region fallthrough
CT: control target
= control target key end

     0   :  { %17 = vsyncpa [#allocation3], 0  ;;  %s2357_s0 = inlined_call_operand.hbm [shape: f32[2,8,32], index: 0, kind: input, shape index: {}]   ;;  %s2358_s1 = inlined_call_operand.vmem [shape: f32[1,32], index: 1, kind: input, shape index: {}]   ;;  %s2359_s2 = inlined_call_operand.vmem [shape: f32[1,32], index: 2, kind: input, shape index: {}]   ;;  %s2360_s3 = inlined_call_operand.vmem [shape: f32[32,96], index: 3, kind: input, shape index: {}]   ;;  %s2361_s4 = inlined_call_operand.vmem [shape: f32[32,32], index: 4, kind: input, shape index: {}]   ;;  %s2362_s5 = inlined_call_operand.vmem [shape: f32[1,32], index: 5, kind: input, shape index: {}]   ;;  %s2363_s6 = inlined_call_operand.vmem [shape: f32[1,32], index: 6, kind: input, shape index: {}]   ;;  %s2364_s7 = inlined_call_operand.vmem [shape: f32[1,32], index: 7, kind: input, shape index: {}]   ;;  %s2365_s8 = inlined_call_operand.vmem [shape: f32[32,64], index: 8, kind: input, shape index: {}]   ;;  %s2366_s9 = inlined_call_operand.vmem [shape: f32[1,64], index: 9, kind: input, shape index: {}]   ;;  %s2367_s10 = inlined_call_operand.vmem [shape: f32[64,32], index: 10, kind: input, shape index: {}]   ;;  %s2368_s11 = inlined_call_operand.vmem [shape: f32[1,32], index: 11, kind: input, shape index: {}]   ;;  %s2369_s12 = inlined_call_operand.hbm [shape: f32[2,8,32], index: 12, kind: output, shape index: {}]  }
   0x1   :  { %19 = vsyncpa [#allocation3 + $0x1], 0 }
   0x2   :  { %20 = vsyncpa [#allocation4], 0 }
   0x3   :  { %22 = vsyncpa [#allocation4 + $0x1], 0  ;;  %s2026_s21 = smov 0   ;;  %s2028_s22 = smov 0  }
   0x4   :  { %s2030_s23 = smov 0   ;;  %s2032_s24 = smov 0  }
   0x5 LB: > { %2377 = sst [smem:[#allocation8_spill]] %s1929_s21  ;;  %s2047_s25 = sadd.s32 4294967295, %s1941_s24   ;;  %s1941_s24 = sphi %s2032_s24, %s2395_s24   ;;  %s1937_s23 = sphi %s2030_s23, %s2397_s23   ;;  %s1933_s22 = sphi %s2028_s22, %s2399_s22   ;;  %s1929_s21 = sphi %s2026_s21, %s2398_s21  }
   0x6   : > { %2378 = sst [smem:[#allocation9_spill]] %s1937_s23  ;;  %s1598_s26 = sadd.s32 4294967294, %s1941_s24  }
   0x7   : > { %s2051_s27 = sadd.s32 1, %s1941_s24   ;;  %s35_s28 = sadd.s32 1, %s1937_s23 }
   0x8   : > { %2379 = sst [smem:[#allocation10_spill]] %s2051_s27  ;;  %s32_s29 = ssub.s32 %s1941_s24, %s2051_s27 }
   0x9   : > { %p42_p0 = scmp.ne.s32.totalorder %s1937_s23, %s1933_s22  ;;  %p33_p1 = scmp.eq.s32.totalorder %s32_s29, 0 }
   0xa   : > { %p43_p2 = scmp.eq.s32.totalorder %s1941_s24, 0  ;;  %p48_p3 = scmp.ne.s32.totalorder %s1933_s22, %s1929_s21 }
   0xb   : > { %p49_p4 = scmp.eq.s32.totalorder %s2047_s25, 0  ;;  %p303_p7 = scmp.eq.s32.totalorder %s2047_s25, 1 }
   0xc   : > { %s2063_s30 = scalar_select %p33_p1, %s1937_s23, %s35_s28  }
   0xd   : > { %p2065_p5 = por %p43_p2, %p42_p0  ;;  %p2069_p6 = por %p49_p4, %p48_p3 }
   0xe   : > { %2380 = sst [smem:[#allocation11_spill]] %s2063_s30  ;;  %p309_p8 = scmp.eq.s32.totalorder %s1598_s26, 1 }
   0xf   : > { %s2382_s14 = scalar_select %p2069_p6, 1, 0 }
  0x10   : > { %p1777_p10 = scmp.lt.s32.totalorder %s1941_s24, 2  ;;  %p2076_p11 = por %p303_p7, %p42_p0 }
  0x11   : > { %p2080_p12 = por %p309_p8, %p48_p3  ;;  %s362_s17 = sand.u32 1, %s1937_s23  }
  0x12   : > { %s2383_s15 = scalar_select %p2076_p11, 1, 0 }
  0x13   : > { %s2384_s16 = scalar_select %p2080_p12, 1, 0 }
  0x14   : > { %s1602_s18 = sshll.u32 %s1941_s24, 7  ;;  %s1601_s19 = sshll.u32 %s362_s17, 3 }
  0x15   : > { %2385 = sst [smem:[#allocation12_spill]] %s2384_s16  ;;  %s2089_s29 = scalar_lea.hbm %s2357_s0, %s1602_s18 }
  0x16   : > { %s366_s26 = scalar_lea.vmem [#allocation2], %s1601_s19  ;;  %p2093_p13 = pnand %p1777_p10, %p2065_p5 }
  0x17   : > { %s373_s30 = sshll.u32 %s366_s26, 4  ;;  %s363_s23 = scalar_lea.sflag [#allocation3], %s362_s17  ;;  %s2097_s30 = int_to_ptr.vmem [resolvable:$true] %s373_s30 }
  0x18   : > { %s1849_s16 = scalar_lea.hbm %s2089_s29, 128  ;;  %p1851_p3 = pneg %p2093_p13 }
  0x19   : > { %p1850_p2 = scmp.ne.s32.totalorder %s2089_s29, %s1849_s16  ;;  %s1854_s13 = scalar_lea.hbm %s2357_s0, 256 }
  0x1a   : > { %p1855_p5 = scmp.lt.s32.totalorder %s2089_s29, %s2357_s0  ;;  %p1856_p8 = scmp.lt.s32.totalorder %s1854_s13, %s1849_s16 }
  0x1b   : > { %p1852_p4 = pnand %p1851_p3, %p1850_p2 }
  0x1c   : > { %p1857_p10 = por %p1856_p8, %p1855_p5 }
  0x1d   : > { %p1853_p7 = pneg %p1852_p4 }
  0x1f   : > { %p1858_p9 = pnand %p1857_p10, %p1853_p7 }
  0x21   : > { %1861 = shalt.err (!%p1858_p9)
}
  0x22   : > { %s1862_s17 = scalar_lea.vmem %s2097_s30, 128  ;;  %s1943_s26 = smov [#allocation2]  }
  0x23   : > { %p1863_p0 = scmp.ne.s32.totalorder %s2097_s30, %s1862_s17  ;;  %s1867_s21 = sshll.u32 %s1943_s26, 4  ;;  %s1868_s21 = int_to_ptr.vmem [resolvable:$false] %s1867_s21 }
  0x24   : > { %s1869_s18 = scalar_lea.vmem %s1868_s21, 256  ;;  %p1870_p4 = scmp.lt.s32.totalorder %s2097_s30, %s1868_s21 }
  0x25   : > { %p1865_p1 = pnand %p1863_p0, %p1851_p3  ;;  %p1871_p12 = scmp.lt.s32.totalorder %s1869_s18, %s1862_s17 }
  0x27   : > { %p1866_p2 = pneg %p1865_p1  ;;  %p1872_p11 = por %p1871_p12, %p1870_p4 }
  0x29   : > { %p1873_p6 = pnand %p1872_p11, %p1866_p2 }
  0x2b   : > { %1876 = shalt.err (!%p1873_p6)
}
  0x2c   : > { %1772 = dma.hbm_to_vmem [thread:$0]  (!%p2093_p13), %s2089_s29, 128, %s2097_s30, %s363_s23  }
  0x2d   : > { %p2387_p9 = scmp.lt.s32.totalorder %s1941_s24, 3  ;;  %p2388_p7 = scmp.ge.s32.totalorder %s1941_s24, 1 }
  0x2f   : > { %p379_p0 = pnand %p2388_p7, %p2387_p9 }
  0x30   : > { %s2124_s16 = sand.u32 (!%p379_p0), 1, %s1933_s22   ;;  %p2389_p6 = scmp.ne.s32.totalorder (!%p379_p0), %s2382_s14, 0 }
  0x31   : > { %382 = sbr.rel (%p379_p0) target bundleno = 2444 (0x98c), region = 68  ;;  %s1604_s21 = sshll.u32 (!%p379_p0), %s2124_s16, 3 }
  0x32   : > { %s385_s19 = scalar_lea.sflag (!%p379_p0), [#allocation3], %s2124_s16  ;;  %s388_s27 = scalar_lea.vmem (!%p379_p0), [#allocation2], %s1604_s21 }
  0x36   : > { %1920 = dma.done.wait (%p2389_p6), %s385_s19, 128  }
  0x37   : > { %1922 = vsyncadd (%p2389_p6), %s385_s19, 4294967168  ;;  %vm432_vm0 = vcmask 261120   ;;  %v2134_v0 = vld [vmem:[%s388_s27] sm:$0xff]  ;;  %v464_v7 = vld [vmem:[%s2360_s3 + $0x18] sm:$0xff]  ;;  %v1944_v8 = vmov 0.0   ;;  %vm1945_vm1 = vmmov 0  }
  0x38   : > { %v433_v1 = vsel %vm432_vm0, %v2134_v0, 0.0  ;;  %1673 = vmatprep.subr.mxu1 %v1944_v8  ;;  %v463_v9 = vld [vmem:[%s2360_s3 + $0x10] sm:$0xff]  ;;  %1681 = vmatprep.mubr.msk.f32.mxu1 %vm1945_vm1, %v1944_v8  ;;  %v462_v10 = vld [vmem:[%s2360_s3 + $0x8] sm:$0xff]  ;;  %v461_v11 = vld [vmem:[%s2360_s3] sm:$0xff]  ;;  %s1946_s23 = smov 120   ;;  %s1947_s30 = smov 96  }
  0x39   : > { %434 = vadd.xlane.f32.xlu0 %v433_v1  ;;  %1674 = vmatpush3.msra.mxu1 %v464_v7  ;;  %v1606_v16 = vld [vmem:[%s2358_s1] ss:$0 sm:$0xff]  ;;  %s1948_s14 = smov 88   ;;  %s1949_s29 = smov 80   ;;  %vm541_vm2 = vcmask 64512   ;;  %vm1211_vm3 = vcmask 130048  }
  0x3a   : > { %1694 = vmatprep.subr.mxu0 %v1944_v8  ;;  %1675 = vmatprep.subr.mxu1 %v1944_v8  ;;  %v1607_v18 = vld [vmem:[%s2359_s2] ss:$0 sm:$0xff]  ;;  %s1950_s13 = smov 112   ;;  %s1951_s20 = smov 72   ;;  %vm1213_vm4 = vcmask 195584   ;;  %vm1438_vm5 = vcmask 523264  }
  0x3b   : > { %1696 = vmatprep.mubr.msk.f32.mxu0 %vm1945_vm1, %v1944_v8  ;;  %1676 = vmatpush3.msra.mxu1 %v463_v9  ;;  %s1952_s28 = smov 104   ;;  %s1953_s17 = smov 64  }
  0x3c   : > { %1677 = vmatprep.subr.mxu1 %v1944_v8  ;;  %s1954_s26 = smov 48   ;;  %s1955_s18 = smov 40  }
  0x3d   : > { %1678 = vmatpush3.msra.mxu1 %v462_v10  ;;  %s1956_s19 = smov 56   ;;  %p2390_p12 = scmp.ne.s32.totalorder %s2383_s15, 0 }
  0x3e   : > { %1679 = vmatprep.subr.mxu1 %v1944_v8 }
  0x3f   : > { %1680 = vmatpush3.msra.mxu1 %v461_v11 }
  0x40   : > { %1684 = vmatprep.subr.mxu1 %v1944_v8 }
  0xc2   : > { %v435_v2 = vpop.xlane.xlu0 %434 }
  0xc3   : > { %v437_v3 = vmul.f32 0.03125, %v435_v2 }
  0xc5   : > { %v438_v4 = vsub.f32 %v2134_v0, %v437_v3 }
  0xc7   : > { %v439_v5 = vmul.f32 %v438_v4, %v438_v4 }
  0xc9   : > { %v440_v6 = vsel %vm432_vm0, %v439_v5, 0.0 }
  0xca   : > { %441 = vadd.xlane.f32.xlu0 %v440_v6 }
 0x153   : > { %v442_v12 = vpop.xlane.xlu0 %441 }
 0x154   : > { %v443_v13 = vmul.f32 0.03125, %v442_v12 }
 0x156   : > { %v444_v14 = vadd.f32 1e-05, %v443_v13 }
 0x158   : > { %1827 = vrsqrt.f32 %v444_v14 }
 0x165   : > { %v1828_v15 = vpop.eup %1827 }
 0x166   : > { %v446_v17 = vmul.f32 %v1828_v15, %v438_v4 }
 0x168   : > { %v453_v19 = vmul.f32 %v1606_v16, %v446_v17  ;;  %v1218_v16 = vld [vmem:[%s2361_s4 + $0x18] sm:$0xff]  ;;  %v1217_v17 = vld [vmem:[%s2361_s4 + $0x10] sm:$0xff] }
 0x16a   : > { %v460_v20 = vadd.f32 %v1607_v18, %v453_v19  ;;  %v1216_v19 = vld [vmem:[%s2361_s4 + $0x8] sm:$0xff] }
 0x16c   : > { %1682 = vmatmul.mubr.msk.f32.vlgmr.msra.gmra.mxu1 %vm432_vm0, %v460_v20 }
 0x16d   : > { %1686 = vmatprep.mubr.msk.f32.mxu1 %vm1945_vm1, %v1944_v8 }
 0x22c   : > { %v2171_v21 = vpop.f32.mrf.mxu1 }
 0x22d   : > { %703 = vrot.lane.b32.xlu0 %v2171_v21, %s1946_s23  ;;  %539 = vrot.lane.b32.xlu1 %v2171_v21, %s1947_s30 }
 0x22e   : > { %v1683_v22 = vpop.f32.mrf.mxu1 }
 0x231   : > { %705 = vrot.lane.b32.xlu1 %v2171_v21, %s1948_s14  ;;  %s1515_s14 = scalar_lea.sflag [#allocation4], %s2124_s16 }
 0x235   : > { %870 = vrot.lane.b32.xlu1 %v2171_v21, %s1949_s29 }
 0x239   : > { %868 = vrot.lane.b32.xlu1 %v2171_v21, %s1950_s13 }
 0x23d   : > { %1035 = vrot.lane.b32.xlu1 %v2171_v21, %s1951_s20 }
 0x241   : > { %1033 = vrot.lane.b32.xlu1 %v2171_v21, %s1952_s28 }
 0x29f   : > { %v540_v23 = vpop.permute.xlu1 %539  ;;  %v704_v25 = vpop.permute.xlu0 %703 }
 0x2a0   : > { %1685 = vmatpush3.xpose.msk.msra.mxu1 %vm541_vm2, %v540_v23 }
 0x2a1   : > { %1689 = vmatprep.subr.mxu1 %v1944_v8 }
 0x2a3   : > { %1687 = vmatmul.mubr.msk.f32.vlgmr.msra.gmra.mxu1 %vm541_vm2, %v2171_v21  ;;  %v706_v24 = vpop.permute.xlu1 %705 }
 0x2a4   : > { %1695 = vmatpush3.xpose.msk.msra.mxu0 %vm541_vm2, %v706_v24  ;;  %1691 = vmatprep.mubr.msk.f32.mxu1 %vm1945_vm1, %v1944_v8 }
 0x2a5   : > { %1704 = vmatprep.subr.mxu0 %v1944_v8 }
 0x2a7   : > { %1697 = vmatmul.mubr.msk.f32.vlgmr.msra.gmra.mxu0 %vm541_vm2, %v704_v25  ;;  %v871_v26 = vpop.permute.xlu1 %870 }
 0x2a8   : > { %1705 = vmatpush3.xpose.msk.msra.mxu0 %vm541_vm2, %v871_v26  ;;  %1706 = vmatprep.mubr.msk.f32.mxu0 %vm1945_vm1, %v1944_v8 }
 0x2a9   : > { %1714 = vmatprep.subr.mxu0 %v1944_v8 }
 0x2ab   : > { %v869_v27 = vpop.permute.xlu1 %868 }
 0x2ac   : > { %1707 = vmatmul.mubr.msk.f32.vlgmr.msra.gmra.mxu0 %vm541_vm2, %v869_v27 }
 0x2ad   : > { %1716 = vmatprep.mubr.msk.f32.mxu0 %vm1945_vm1, %v1944_v8 }
 0x2af   : > { %v1036_v28 = vpop.permute.xlu1 %1035 }
 0x2b0   : > { %1715 = vmatpush3.xpose.msk.msra.mxu0 %vm541_vm2, %v1036_v28 }
 0x2b1   : > { %1724 = vmatprep.subr.mxu0 %v1944_v8 }
 0x2b3   : > { %v1034_v29 = vpop.permute.xlu1 %1033 }
 0x2b4   : > { %1717 = vmatmul.mubr.msk.f32.vlgmr.msra.gmra.mxu0 %vm541_vm2, %v1034_v29 }
 0x2b5   : > { %1732 = vmatprep.mubr.msk.f32.mxu0 %vm1945_vm1, %v1944_v8  ;;  %1725 = vmatpush3.msra.mxu0 %v1218_v16 }
 0x2b6   : > { %1726 = vmatprep.subr.mxu0 %v1944_v8 }
 0x2b7   : > { %1727 = vmatpush3.msra.mxu0 %v1217_v17 }
 0x2b8   : > { %1728 = vmatprep.subr.mxu0 %v1944_v8 }
 0x2b9   : > { %1729 = vmatpush3.msra.mxu0 %v1216_v19 }
 0x2ba   : > { %1730 = vmatprep.subr.mxu0 %v1944_v8 }
 0x363   : > { %v612_v30 = vpop.f32.mrf.mxu1 }
 0x364   : > { %v616_v31 = vsel %vm541_vm2, %v612_v30, -inf }
 0x365   : > { %617 = vmax.xlane.f32.xlu1 %v616_v31  ;;  %v1688_v32 = vpop.f32.mrf.mxu1 }
 0x367   : > { %v777_v33 = vpop.f32.mrf.mxu0 }
 0x368   : > { %v781_v34 = vsel %vm541_vm2, %v777_v33, -inf }
 0x369   : > { %782 = vmax.xlane.f32.xlu0 %v781_v34  ;;  %v1698_v35 = vpop.f32.mrf.mxu0 }
 0x36a   : > { %v1622_v35 = vld [vmem:[%s2362_s5] ss:$0 sm:$0xff] }
 0x36c   : > { %v942_v36 = vpop.f32.mrf.mxu0 }
 0x36d   : > { %v946_v37 = vsel %vm541_vm2, %v942_v36, -inf }
 0x36e   : > { %v1708_v38 = vpop.f32.mrf.mxu0  ;;  %947 = vmax.xlane.f32.xlu1 %v946_v37 }
 0x374   : > { %v1107_v39 = vpop.f32.mrf.mxu0 }
 0x375   : > { %v1111_v40 = vsel %vm541_vm2, %v1107_v39, -inf }
 0x376   : > { %1112 = vmax.xlane.f32.xlu0 %v1111_v40  ;;  %v1718_v41 = vpop.f32.mrf.mxu0 }
 0x37f   : > { %627 = vrot.lane.b32.xlu1 %v2171_v21, %s1953_s17  ;;  %s1957_s17 = smov 8  }
 0x3ee   : > { %v618_v42 = vpop.xlane.xlu1 %617 }
 0x3ef   : > { %v619_v43 = vsub.f32 %v612_v30, %v618_v42 }
 0x3f1   : > { %v620_v44 = vmul.f32 1.442695, %v619_v43 }
 0x3f2   : > { %v783_v45 = vpop.xlane.xlu0 %782 }
 0x3f3   : > { %1829 = vpow2.f32 %v620_v44  ;;  %v784_v46 = vsub.f32 %v777_v33, %v783_v45  ;;  %v1333_v45 = vld [vmem:[%s2365_s8 + $0x18] sm:$0xff] }
 0x3f5   : > { %v785_v47 = vmul.f32 1.442695, %v784_v46  ;;  %v1331_v46 = vld [vmem:[%s2365_s8 + $0x8] sm:$0xff] }
 0x3f7   : > { %1831 = vpow2.f32 %v785_v47  ;;  %v948_v48 = vpop.xlane.xlu1 %947  ;;  %v1330_v47 = vld [vmem:[%s2365_s8] sm:$0xff] }
 0x3f8   : > { %v949_v49 = vsub.f32 %v942_v36, %v948_v48 }
 0x3fa   : > { %v950_v50 = vmul.f32 1.442695, %v949_v49 }
 0x3fb   : > { %v628_v51 = vpop.permute.xlu1 %627 }
 0x3fc   : > { %1833 = vpow2.f32 %v950_v50  ;;  %1690 = vmatpush3.msra.mxu1 %v628_v51 }
 0x3fd   : > { %1699 = vmatprep.subr.mxu1 %v1944_v8 }
 0x3ff   : > { %v1113_v52 = vpop.xlane.xlu0 %1112 }
 0x400   : > { %v1830_v53 = vpop.eup %1829  ;;  %v1114_v54 = vsub.f32 %v1107_v39, %v1113_v52  ;;  %v1623_v52 = vld [vmem:[%s2363_s6] ss:$0 sm:$0xff] }
 0x401   : > { %v622_v55 = vsel %vm541_vm2, %v1830_v53, 0.0 }
 0x402   : > { %v1115_v56 = vmul.f32 1.442695, %v1114_v54  ;;  %623 = vadd.xlane.f32.xlu1 %v622_v55  ;;  %v1624_v54 = vld [vmem:[%s2364_s7] ss:$0 sm:$0xff] }
 0x404   : > { %v1832_v57 = vpop.eup %1831  ;;  %1835 = vpow2.f32 %v1115_v56 }
 0x405   : > { %v787_v58 = vsel %vm541_vm2, %v1832_v57, 0.0 }
 0x406   : > { %788 = vadd.xlane.f32.xlu0 %v787_v58  ;;  %v1429_v58 = vld [vmem:[%s2367_s10 + $0x30] sm:$0xff] }
 0x409   : > { %v1834_v59 = vpop.eup %1833 }
 0x40a   : > { %v952_v60 = vsel %vm541_vm2, %v1834_v59, 0.0 }
 0x40b   : > { %953 = vadd.xlane.f32.xlu1 %v952_v60  ;;  %v1427_v60 = vld [vmem:[%s2367_s10 + $0x20] sm:$0xff] }
 0x411   : > { %v1836_v61 = vpop.eup %1835 }
 0x412   : > { %v1117_v62 = vsel %vm541_vm2, %v1836_v61, 0.0 }
 0x413   : > { %1118 = vadd.xlane.f32.xlu0 %v1117_v62  ;;  %v1425_v62 = vld [vmem:[%s2367_s10 + $0x10] sm:$0xff] }
 0x41c   : > { %957 = vrot.lane.b32.xlu1 %v2171_v21, %s1954_s26  ;;  %s1958_s26 = smov 16  }
 0x420   : > { %1122 = vrot.lane.b32.xlu1 %v2171_v21, %s1955_s18  ;;  %s1959_s18 = smov 24  }
 0x429   : > { %792 = vrot.lane.b32.xlu0 %v2171_v21, %s1956_s19  ;;  %v1215_v21 = vld [vmem:[%s2361_s4] sm:$0xff] }
 0x42a   : > { %1731 = vmatpush3.msra.mxu0 %v1215_v21 }
 0x42b   : > { %1746 = vmatprep.subr.mxu0 %v1944_v8 }
 0x48b   : > { %v624_v63 = vpop.xlane.xlu1 %623 }
 0x48c   : > { %1837 = vrcp.f32 %v624_v63  ;;  %v1424_v63 = vld [vmem:[%s2367_s10 + $0x8] sm:$0xff] }
 0x48f   : > { %v789_v1 = vpop.xlane.xlu0 %788 }
 0x490   : > { %1839 = vrcp.f32 %v789_v1  ;;  %v1423_v1 = vld [vmem:[%s2367_s10] sm:$0xff] }
 0x494   : > { %v954_v2 = vpop.xlane.xlu1 %953 }
 0x495   : > { %1841 = vrcp.f32 %v954_v2  ;;  %v1625_v2 = vld [vmem:[%s2366_s9] ss:$0 sm:$0xff] }
 0x498   : > { %v958_v7 = vpop.permute.xlu1 %957 }
 0x499   : > { %v1838_v3 = vpop.eup %1837 }
 0x49a   : > { %v626_v4 = vmul.f32 %v1838_v3, %v1830_v53 }
 0x49c   : > { %v1119_v5 = vpop.xlane.xlu0 %1118  ;;  %1692 = vmatmul.mubr.msk.f32.vlgmr.msra.gmra.mxu1 %vm541_vm2, %v626_v4  ;;  %v1123_v13 = vpop.permute.xlu1 %1122 }
 0x49d   : > { %v1840_v6 = vpop.eup %1839  ;;  %1843 = vrcp.f32 %v1119_v5  ;;  %1701 = vmatprep.mubr.msk.f32.mxu1 %vm1945_vm1, %v1944_v8 }
 0x49e   : > { %v791_v10 = vmul.f32 %v1840_v6, %v1832_v57  ;;  %v1430_v57 = vld [vmem:[%s2367_s10 + $0x38] sm:$0xff] }
 0x4a0   : > { %v793_v9 = vpop.permute.xlu0 %792 }
 0x4a1   : > { %1700 = vmatpush3.msra.mxu1 %v793_v9 }
 0x4a2   : > { %v1842_v11 = vpop.eup %1841  ;;  %1702 = vmatmul.mubr.msk.f32.vlgmr.msra.gmra.mxu1 %vm541_vm2, %v791_v10  ;;  %1709 = vmatprep.subr.mxu1 %v1944_v8 }
 0x4a3   : > { %1710 = vmatpush3.msra.mxu1 %v958_v7  ;;  %1711 = vmatprep.mubr.msk.f32.mxu1 %vm1945_vm1, %v1944_v8  ;;  %v956_v12 = vmul.f32 %v1842_v11, %v1834_v59  ;;  %v1428_v59 = vld [vmem:[%s2367_s10 + $0x28] sm:$0xff] }
 0x4a4   : > { %1719 = vmatprep.subr.mxu1 %v1944_v8 }
 0x4a6   : > { %1712 = vmatmul.mubr.msk.f32.vlgmr.msra.gmra.mxu1 %vm541_vm2, %v956_v12 }
 0x4a7   : > { %1720 = vmatpush3.msra.mxu1 %v1123_v13  ;;  %1721 = vmatprep.mubr.msk.f32.mxu1 %vm1945_vm1, %v1944_v8 }
 0x4a8   : > { %1735 = vmatprep.subr.mxu1 %v1944_v8 }
 0x4aa   : > { %v1844_v14 = vpop.eup %1843 }
 0x4ab   : > { %v1121_v15 = vmul.f32 %v1844_v14, %v1836_v61  ;;  %v1426_v61 = vld [vmem:[%s2367_s10 + $0x18] sm:$0xff] }
 0x4ad   : > { %1722 = vmatmul.mubr.msk.f32.vlgmr.msra.gmra.mxu1 %vm541_vm2, %v1121_v15  ;;  %v1627_v15 = vld [vmem:[%s2368_s11] ss:$0 sm:$0xff] }
 0x4ae   : > { %1743 = vmatprep.mubr.msk.f32.mxu1 %vm1945_vm1, %v1944_v8  ;;  %1736 = vmatpush3.msra.mxu1 %v1333_v45 }
 0x4af   : > { %1737 = vmatprep.subr.mxu1 %v1944_v8 }
 0x55c   : > { %v699_v18 = vpop.f32.mrf.mxu1 }
 0x55e   : > { %v1693_v20 = vpop.f32.mrf.mxu1 }
 0x562   : > { %v864_v22 = vpop.f32.mrf.mxu1 }
 0x563   : > { %1199 = vrot.lane.b32.xlu0 %v864_v22, %s1957_s17 }
 0x564   : > { %v1703_v23 = vpop.f32.mrf.mxu1 }
 0x566   : > { %v1029_v24 = vpop.f32.mrf.mxu1 }
 0x567   : > { %1203 = vrot.lane.b32.xlu1 %v1029_v24, %s1958_s26  ;;  %s1630_s26 = sshll.u32 %s2047_s25, 7  ;;  %s1960_s25 = smov [#allocation5]  }
 0x568   : > { %v1713_v25 = vpop.f32.mrf.mxu1  ;;  %s1526_s30 = scalar_lea.hbm %s2369_s12, %s1630_s26 }
 0x56d   : > { %v1194_v26 = vpop.f32.mrf.mxu1 }
 0x56e   : > { %1207 = vrot.lane.b32.xlu0 %v1194_v26, %s1959_s18  ;;  %s428_s18 = scalar_lea.vmem [#allocation5], %s1604_s21  ;;  %s1881_s21 = sshll.u32 %s1960_s25, 4  ;;  %s1882_s21 = int_to_ptr.vmem [resolvable:$false] %s1881_s21 }
 0x56f   : > { %v1723_v27 = vpop.f32.mrf.mxu1  ;;  %s1528_s19 = sshll.u32 %s428_s18, 4  ;;  %s1883_s13 = scalar_lea.vmem %s1882_s21, 256  ;;  %s1529_s19 = int_to_ptr.vmem [resolvable:$true] %s1528_s19 }
 0x570   : > { %s1877_s29 = scalar_lea.vmem %s1529_s19, 128  ;;  %p1884_p3 = scmp.lt.s32.totalorder %s1529_s19, %s1882_s21 }
 0x571   : > { %p1878_p11 = scmp.ne.s32.totalorder %s1529_s19, %s1877_s29  ;;  %p1885_p5 = scmp.lt.s32.totalorder %s1883_s13, %s1877_s29 }
 0x573   : > { %p1879_p13 = pnand %p1878_p11, %p2390_p12  ;;  %p1886_p8 = por %p1885_p5, %p1884_p3 }
 0x575   : > { %p1880_p1 = pneg %p1879_p13 }
 0x577   : > { %p1887_p10 = pnand %p1886_p8, %p1880_p1 }
 0x5d5   : > { %v1200_v28 = vpop.permute.xlu0 %1199 }
 0x5d6   : > { %v1210_v30 = vsel %vm541_vm2, %v699_v18, %v1200_v28 }
 0x5d9   : > { %v1204_v29 = vpop.permute.xlu1 %1203 }
 0x5da   : > { %v1212_v31 = vsel %vm1211_vm3, %v1210_v30, %v1204_v29 }
 0x5e0   : > { %v1208_v32 = vpop.permute.xlu0 %1207 }
 0x5e1   : > { %v1214_v33 = vsel %vm1213_vm4, %v1212_v31, %v1208_v32 }
 0x5e2   : > { %1733 = vmatmul.mubr.msk.f32.vlgmr.msra.gmra.mxu0 %vm432_vm0, %v1214_v33 }
 0x5e3   : > { %1762 = vmatprep.mubr.msk.f32.mxu0 %vm1945_vm1, %v1944_v8  ;;  %1747 = vmatpush3.msra.mxu0 %v1430_v57 }
 0x5e4   : > { %1748 = vmatprep.subr.mxu0 %v1944_v8 }
 0x5e5   : > { %1749 = vmatpush3.msra.mxu0 %v1429_v58 }
 0x5e6   : > { %1750 = vmatprep.subr.mxu0 %v1944_v8 }
 0x5e7   : > { %1751 = vmatpush3.msra.mxu0 %v1428_v59 }
 0x5e8   : > { %1752 = vmatprep.subr.mxu0 %v1944_v8 }
 0x5e9   : > { %1753 = vmatpush3.msra.mxu0 %v1427_v60 }
 0x5ea   : > { %1754 = vmatprep.subr.mxu0 %v1944_v8 }
 0x5eb   : > { %1755 = vmatpush3.msra.mxu0 %v1426_v61 }
 0x5ec   : > { %1756 = vmatprep.subr.mxu0 %v1944_v8 }
 0x5ed   : > { %1757 = vmatpush3.msra.mxu0 %v1425_v62 }
 0x5ee   : > { %1758 = vmatprep.subr.mxu0 %v1944_v8 }
 0x5ef   : > { %1759 = vmatpush3.msra.mxu0 %v1424_v63 }
 0x5f0   : > { %1760 = vmatprep.subr.mxu0 %v1944_v8 }
 0x5f1   : > { %1761 = vmatpush3.msra.mxu0 %v1423_v1 }
 0x6a2   : > { %v1288_v34 = vpop.f32.mrf.mxu0 }
 0x6a3   : > { %v1292_v36 = vadd.f32 %v1288_v34, %v2134_v0  ;;  %v1332_v0 = vld [vmem:[%s2365_s8 + $0x10] sm:$0xff] }
 0x6a4   : > { %v1734_v37 = vpop.f32.mrf.mxu0  ;;  %1738 = vmatpush3.msra.mxu1 %v1332_v0 }
 0x6a5   : > { %v2253_v38 = vadd.f32 %v1622_v35, %v1292_v36  ;;  %1739 = vmatprep.subr.mxu1 %v1944_v8 }
 0x6a6   : > { %1740 = vmatpush3.msra.mxu1 %v1331_v46 }
 0x6a7   : > { %v1303_v39 = vsel %vm432_vm0, %v2253_v38, 0.0  ;;  %1741 = vmatprep.subr.mxu1 %v1944_v8 }
 0x6a8   : > { %1304 = vadd.xlane.f32.xlu1 %v1303_v39  ;;  %1742 = vmatpush3.msra.mxu1 %v1330_v47 }
 0x731   : > { %v1305_v40 = vpop.xlane.xlu1 %1304 }
 0x732   : > { %v1306_v41 = vmul.f32 0.03125, %v1305_v40 }
 0x734   : > { %v1307_v42 = vsub.f32 %v2253_v38, %v1306_v41 }
 0x736   : > { %v1308_v43 = vmul.f32 %v1307_v42, %v1307_v42 }
 0x738   : > { %v1309_v44 = vsel %vm432_vm0, %v1308_v43, 0.0 }
 0x739   : > { %1310 = vadd.xlane.f32.xlu0 %v1309_v44 }
 0x7c2   : > { %v1311_v48 = vpop.xlane.xlu0 %1310 }
 0x7c3   : > { %v1312_v49 = vmul.f32 0.03125, %v1311_v48 }
 0x7c5   : > { %v1313_v50 = vadd.f32 1e-05, %v1312_v49 }
 0x7c7   : > { %1845 = vrsqrt.f32 %v1313_v50 }
 0x7d4   : > { %v1846_v51 = vpop.eup %1845 }
 0x7d5   : > { %v1315_v53 = vmul.f32 %v1846_v51, %v1307_v42 }
 0x7d7   : > { %v1322_v55 = vmul.f32 %v1623_v52, %v1315_v53 }
 0x7d9   : > { %v1329_v56 = vadd.f32 %v1624_v54, %v1322_v55 }
 0x7db   : > { %1744 = vmatmul.mubr.msk.f32.vlgmr.msra.gmra.mxu1 %vm432_vm0, %v1329_v56 }
 0x89b   : > { %v1410_v3 = vpop.f32.mrf.mxu1 }
 0x89c   : > { %v1411_v4 = vadd.f32 %v1625_v2, %v1410_v3 }
 0x89d   : > { %v1745_v5 = vpop.f32.mrf.mxu1 }
 0x89e   : > { %v1415_v6 = vmul.f32 %v1411_v4, %v1411_v4  ;;  %v1414_v13 = vmul.f32 0.5, %v1411_v4 }
 0x8a0   : > { %v1416_v7 = vmul.f32 %v1415_v6, %v1411_v4 }
 0x8a2   : > { %v1417_v9 = vmul.f32 0.044715, %v1416_v7 }
 0x8a4   : > { %v1418_v10 = vadd.f32 %v1417_v9, %v1411_v4 }
 0x8a6   : > { %v1419_v11 = vmul.f32 0.7978846, %v1418_v10 }
 0x8a8   : > { %1847 = vtanh.f32 %v1419_v11 }
 0x8b5   : > { %v1848_v12 = vpop.eup %1847 }
 0x8b6   : > { %v1421_v8 = vadd.f32 1.0, %v1848_v12 }
 0x8b8   : > { %v1422_v14 = vmul.f32 %v1421_v8, %v1414_v13 }
 0x8ba   : > { %1763 = vmatmul.mubr.msk.f32.vlgmr.msra.gmra.mxu0 %vm1438_vm5, %v1422_v14 }
 0x97a   : > { %v1508_v16 = vpop.f32.mrf.mxu0 }
 0x97b   : > { %v1509_v17 = vadd.f32 %v1627_v15, %v1508_v16 }
 0x97c   : > { %v1764_v18 = vpop.f32.mrf.mxu0 }
 0x97d   : > { %v1512_v19 = vadd.f32 %v1509_v17, %v2253_v38 }
 0x97f   : > { %1513 = vst.msk [vmem:[%s428_s18] sm:$0xff] %vm432_vm0, %v1512_v19 }
 0x980   : > { %1890 = shalt.err (!%p1887_p10)
}
 0x981   : > { %s1891_s20 = scalar_lea.hbm %s1526_s30, 128  ;;  %s1895_s17 = scalar_lea.hbm %s2369_s12, 256 }
 0x982   : > { %p1892_p2 = scmp.ne.s32.totalorder %s1526_s30, %s1891_s20  ;;  %p1896_p7 = scmp.lt.s32.totalorder %s1526_s30, %s2369_s12 }
 0x983   : > { %p1897_p0 = scmp.lt.s32.totalorder %s1895_s17, %s1891_s20 }
 0x984   : > { %p1893_p4 = pnand %p1892_p2, %p2390_p12 }
 0x985   : > { %p1898_p6 = por %p1897_p0, %p1896_p7 }
 0x986   : > { %p1894_p9 = pneg %p1893_p4 }
 0x988   : > { %p1899_p11 = pnand %p1898_p6, %p1894_p9 }
 0x98a   : > { %1902 = shalt.err (!%p1899_p11)
}
 0x98b   : > { %1767 = dma.vmem_to_hbm [thread:$0]  (%p2390_p12), %s1529_s19, 128, %s1526_s30, %s1515_s14  }
 0x98c PF: > { %s2391_s27 = sld [smem:[#allocation8_spill]]  ;;  %p2394_p1 = scmp.ge.s32.totalorder %s1941_s24, 2 }
 0x98d   : > { %s2392_s23 = sld [smem:[#allocation12_spill]] }
 0x992   : > { %s1540_s29 = sand.u32 1, %s2391_s27  }
 0x993   : > { %p2393_p13 = scmp.ne.s32.totalorder %s2392_s23, 0  ;;  %s1541_s25 = scalar_lea.sflag [#allocation4], %s1540_s29 }
 0x995   : > { %p1774_p3 = pnand %p2394_p1, %p2393_p13 }
 0x997   : > { %p1775_p5 = pneg %p1774_p3 }
 0x999   : > { %1924 = dma.done.wait (%p1775_p5), %s1541_s25, 128  }
 0x99a   : > { %1926 = vsyncadd (%p1775_p5), %s1541_s25, 4294967168  ;;  %s2395_s24 = sld [smem:[#allocation10_spill]]  ;;  %s2398_s21 = smov %s1933_s22 }
 0x99b   : > { %s2396_s13 = sld [smem:[#allocation9_spill]] }
 0x99c   : > { %s2397_s23 = sld [smem:[#allocation11_spill]] }
 0x9a0   : > { %p25_p8 = scmp.ge.s32.totalorder %s2395_s24, 4  }
 0x9a1   : > { %s2399_s22 = smov %s2396_s13 }
 0x9a2   :  { %27 = sbr.rel (!%p25_p8) target bundleno = 5 (0x5), region = 113 }
 0x9a7   :  { %1546 = vsyncpa [#allocation3], 1 }
 0x9a8   :  { %1548 = vsyncpa [#allocation3 + $0x1], 1 }
 0x9a9   :  { %1549 = vsyncpa [#allocation4], 1 }
 0x9aa   :  { %1551 = vsyncpa [#allocation4 + $0x1], 1 }

</bundles_post_ra>
